<compile_context>
chip_gen: v7x
topology: tpu7x:2x2x1
jax: 0.10.0
libtpu: 0.0.40
codegen_flags: <defaults>
</compile_context>

<pallas_src>
import math

import jax
import jax.numpy as jnp
from jax.experimental import pallas as pl
from jax.experimental.pallas import tpu as pltpu


def _pe_kernel(x_ref, e_ref, phase_ref, o_ref):
    # x_ref:     (TR, PACK)     f32 -- PACK original (node, channel) scalars per row
    # e_ref:     (PACK, PACK*H) f32 -- block-diagonal div_term expansion
    # phase_ref: (1, PACK*H)    f32 -- 0 (sin) on even lanes, pi/2 (cos) on odd lanes
    # o_ref:     (TR, PACK*H)   f32
    arg = jnp.dot(x_ref[...], e_ref[...], preferred_element_type=jnp.float32)  # MXU
    o_ref[...] = jnp.sin(arg + phase_ref[...]).astype(o_ref.dtype)             # 1x EUP


def _round_up(a, b):
    return ((a + b - 1) // b) * b


def positional_encoding(x, hidden_dim=32, max_row_tile=1024):
    """x: (N, 6, 1) float -> (N, 6, hidden_dim) float32 (eval-mode dropout = identity)."""
    N, C, _ = x.shape
    H = hidden_dim
    assert H % 2 == 0, "hidden_dim must be even (sin/cos interleave)"
    assert 128 % H == 0, "lane packing assumes hidden_dim divides 128"
    PACK = 128 // H          # original rows packed per 128-lane output row
    W = PACK * H             # = 128

    R = N * C                # total (node, channel) rows
    R_pack = pl.cdiv(R, PACK)

    # Packed-row tile: a single block for small problems, large tiles otherwise.
    tile = min(max_row_tile, _round_up(R_pack, 8))
    Rp = _round_up(R_pack, tile)
    grid = (Rp // tile,)

    # div_term as in the PyTorch module: exp(arange(0, H, 2) * (-ln(10000)/H)),
    # repeated pairwise to full width: div_full[j] = div_term[j // 2].
    div_term = jnp.exp(
        jnp.arange(0, H, 2, dtype=jnp.float32) * (-math.log(10000.0) / H)
    )
    div_full = jnp.repeat(div_term, 2)                                       # (H,)
    # Block-diagonal expansion: (x_packed @ E)[r, g*H + j] = x[PACK*r + g] * div_full[j].
    E = jnp.kron(jnp.eye(PACK, dtype=jnp.float32), div_full[None, :])        # (PACK, W)
    # Phase offset folds the parity select into a single sin: cos(a) = sin(a + pi/2).
    phase = jnp.tile(jnp.array([0.0, math.pi / 2.0], jnp.float32), W // 2).reshape(1, W)

    # Flatten, pad to Rp*PACK rows, pack PACK rows per 128-lane row.
    x_flat = x.reshape(R).astype(jnp.float32)
    x_flat = jnp.pad(x_flat, (0, Rp * PACK - R))
    x_packed = x_flat.reshape(Rp, PACK)

    out = pl.pallas_call(
        _pe_kernel,
        out_shape=jax.ShapeDtypeStruct((Rp, W), jnp.float32),
        grid_spec=pltpu.PrefetchScalarGridSpec(
            num_scalar_prefetch=0,
            grid=grid,
            in_specs=[
                pl.BlockSpec((tile, PACK), lambda i: (i, 0)),
                pl.BlockSpec((PACK, W), lambda i: (0, 0)),   # VMEM-resident constant
                pl.BlockSpec((1, W), lambda i: (0, 0)),      # VMEM-resident constant
            ],
            out_specs=pl.BlockSpec((tile, W), lambda i: (i, 0)),
        ),
        compiler_params=pltpu.CompilerParams(dimension_semantics=("parallel",)),
    )(x_packed, E, phase)

    # (Rp, PACK*H) is a row-major view of (Rp*PACK, H): unpack, drop padding.
    return out.reshape(Rp * PACK, H)[:R].reshape(N, C, H)


def _reference(x, hidden_dim=32):
    """Pure-JAX reference mirroring the PyTorch forward (eval-mode dropout)."""
    half = hidden_dim // 2
    div_term = jnp.exp(
        jnp.arange(0, hidden_dim, 2, dtype=jnp.float32) * (-math.log(10000.0) / hidden_dim)
    ).reshape(1, 1, half)
    arg = x.astype(jnp.float32) * div_term                    # (N, 6, H/2)
    pe = jnp.zeros((x.shape[0], x.shape[1], hidden_dim), jnp.float32)
    pe = pe.at[:, :, 0::2].set(jnp.sin(arg))
    pe = pe.at[:, :, 1::2].set(jnp.cos(arg))
    return pe


if __name__ == "__main__":
    key = jax.random.PRNGKey(0)
    N = 16          # n_nodes * batch_size
    C = 6           # concatenated velocity + coordinate channels
    H = 32          # hidden_dim

    x = jax.random.normal(key, (N, C, 1), dtype=jnp.float32)

    out = jax.block_until_ready(positional_encoding(x, hidden_dim=H))
    ref = _reference(x, hidden_dim=H)
    assert out.shape == (N, C, H), out.shape
    # Note: cos(a) is computed as sin(a + pi/2); ulp-level deviation, well within tol.
    assert jnp.allclose(out, ref, atol=1e-5, rtol=1e-5), "mismatch vs reference"

    # A shape the previous kernel's divisibility assert would have rejected.
    x2 = jax.random.normal(jax.random.PRNGKey(1), (13, C, 1), dtype=jnp.float32)
    out2 = jax.block_until_ready(positional_encoding(x2, hidden_dim=H))
    ref2 = _reference(x2, hidden_dim=H)
    assert jnp.allclose(out2, ref2, atol=1e-5, rtol=1e-5), "mismatch vs reference (N=13)"

    print("KERNEL_OK")
</pallas_src>

<mosaic_0001>
module attributes {stable_mosaic.version = 11 : i64} {
  func.func @_pe_kernel(%arg0: i32, %arg1: memref<24x4xf32, #tpu.memory_space<vmem>>, %arg2: memref<4x128xf32, #tpu.memory_space<vmem>>, %arg3: memref<1x128xf32, #tpu.memory_space<vmem>>, %arg4: memref<24x128xf32, #tpu.memory_space<vmem>>) attributes {dimension_semantics = [#tpu.dimension_semantics<parallel>], iteration_bounds = array<i64: 1>, scalar_prefetch = 0 : i64, scratch_operands = 0 : i64, tpu.core_type = #tpu.core_type<tc>, window_params = [{transform_indices = @transform_0, window_bounds = array<i64: 24, 4>}, {pipeline_mode = #tpu.pipeline_mode<synchronous>, transform_indices = @transform_1, window_bounds = array<i64: 4, 128>}, {pipeline_mode = #tpu.pipeline_mode<synchronous>, transform_indices = @transform_2, window_bounds = array<i64: 1, 128>}, {transform_indices = @transform_3, window_bounds = array<i64: 24, 128>}]} {
    %c0 = arith.constant 0 : index
    %c0_0 = arith.constant 0 : index
    %0 = vector.load %arg1[%c0, %c0_0] : memref<24x4xf32, #tpu.memory_space<vmem>>, vector<24x4xf32>
    %c0_1 = arith.constant 0 : index
    %c0_2 = arith.constant 0 : index
    %1 = vector.load %arg2[%c0_1, %c0_2] : memref<4x128xf32, #tpu.memory_space<vmem>>, vector<4x128xf32>
    %cst = arith.constant dense<0.000000e+00> : vector<24x128xf32>
    %2 = tpu.matmul %0, %1, %cst {dimension_numbers = #tpu.dot_dimension_numbers<[1], [0], [0], [1], [0, 0, 1, 1], [], []>} : vector<24x4xf32>, vector<4x128xf32>, vector<24x128xf32> -> vector<24x128xf32>
    %c0_3 = arith.constant 0 : index
    %c0_4 = arith.constant 0 : index
    %3 = vector.load %arg3[%c0_3, %c0_4] : memref<1x128xf32, #tpu.memory_space<vmem>>, vector<1x128xf32>
    %4 = vector.broadcast %3 : vector<1x128xf32> to vector<24x128xf32>
    %5 = arith.addf %2, %4 : vector<24x128xf32>
    %6 = math.sin %5 : vector<24x128xf32>
    %c0_5 = arith.constant 0 : index
    %c0_6 = arith.constant 0 : index
    %7 = vector.load %arg4[%c0_5, %c0_6] : memref<24x128xf32, #tpu.memory_space<vmem>>, vector<24x128xf32>
    tpu.vector_store %arg4[%c0_5, %c0_6], %6 {strides = array<i32>} : memref<24x128xf32, #tpu.memory_space<vmem>>, vector<24x128xf32>,
    return
  }
  func.func @transform_0(%arg0: i32) -> (i32, i32) {
    %c0_i32 = arith.constant 0 : i32
    %c0_i32_0 = arith.constant 0 : i32
    return %arg0, %c0_i32 : i32, i32
  }
  func.func @transform_1(%arg0: i32) -> (i32, i32) {
    %c0_i32 = arith.constant 0 : i32
    %c0_i32_0 = arith.constant 0 : i32
    %c0_i32_1 = arith.constant 0 : i32
    return %c0_i32, %c0_i32_0 : i32, i32
  }
  func.func @transform_2(%arg0: i32) -> (i32, i32) {
    %c0_i32 = arith.constant 0 : i32
    %c0_i32_0 = arith.constant 0 : i32
    %c0_i32_1 = arith.constant 0 : i32
    return %c0_i32, %c0_i32_0 : i32, i32
  }
  func.func @transform_3(%arg0: i32) -> (i32, i32) {
    %c0_i32 = arith.constant 0 : i32
    %c0_i32_0 = arith.constant 0 : i32
    return %arg0, %c0_i32 : i32, i32
  }
}

</mosaic_0001>

<bundles_post_ra>
// kernel: tpu_custom_call.1
= control target key start
LH: loop header
LB: loop body
LE: loop exit
PB: predicated region body
PF: predicated region fallthrough
CT: control target
= control target key end

     0   :  { %vm36_vm0 = vcmask 1043456   ;;  %v544_v1 = vmov 0.0   ;;  %vm26_vm1 = vcmask 31744   ;;  %s760_s0 = inlined_call_operand.vmem [shape: f32[24,4], index: 0, kind: input, shape index: {}]   ;;  %s761_s1 = inlined_call_operand.vmem [shape: f32[4,128], index: 1, kind: input, shape index: {}]   ;;  %s762_s2 = inlined_call_operand.vmem [shape: f32[1,128], index: 2, kind: input, shape index: {}]   ;;  %s763_s3 = inlined_call_operand.hbm [shape: f32[24,128], index: 3, kind: output, shape index: {}]  }
   0x1   :  { %v18_v0 = vld [vmem:[%s761_s1] sm:$0xf]  ;;  %472 = vmatprep.subr.mxu0 %v544_v1  ;;  %483 = vmatprep.subr.mxu1 %v544_v1  ;;  %v16_v3 = vld [vmem:[%s760_s0 + $0x8] sm:$0xff] }
   0x2   :  { %v15_v2 = vld [vmem:[%s760_s0] sm:$0xff]  ;;  %473 = vmatpush3.msk.msra.mxu0 %vm36_vm0, %v18_v0  ;;  %484 = vmatpush3.msk.msra.mxu1 %vm36_vm0, %v18_v0 }
   0x3   :  { %8 = vsyncpa [#allocation3], 0  ;;  %vm545_vm2 = vmmov 0   ;;  %v17_v4 = vld [vmem:[%s760_s0 + $0x10] sm:$0xff]  ;;  %v451_v5 = vld [vmem:[%s762_s2] ss:$0 sm:$0xff] }
   0x4   :  { %474 = vmatprep.mubr.msk.f32.mxu0 %vm545_vm2, %v544_v1  ;;  %477 = vmatprep.mubr.msk.f32.mxu1 %vm545_vm2, %v544_v1  ;;  %v546_v40 = vmov 683565275   ;;  %v547_v42 = vmov 2475754826   ;;  %v548_v44 = vmov 2131351028  }
   0x5   :  { %475 = vmatmul.mubr.msk.f32.vlgmr.msra.gmra.mrb[0].mxu0 %vm26_vm1, %v15_v2  ;;  %478 = vmatmul.mubr.msk.f32.vlgmr.msra.gmra.mrb[0].mxu1 %vm26_vm1, %v16_v3  ;;  %v549_v46 = vmov 2102212464   ;;  %v550_v48 = vmov 920167782   ;;  %v551_v57 = vmov 1326507024  }
   0x6   :  { %480 = vmatprep.mubr.msk.f32.mxu1 %vm545_vm2, %v544_v1  ;;  %s552_s0 = smov [#allocation2]  }
   0x7   :  { %s440_s2 = sshll.u32 %s552_s0, 4  ;;  %s441_s2 = int_to_ptr.vmem [resolvable:$true] %s440_s2 }
   0x8   :  { %s520_s21 = scalar_lea.vmem %s441_s2, 384  ;;  %p525_p1 = scmp.lt.s32.totalorder %s441_s2, %s441_s2 }
   0x9   :  { %481 = vmatmul.mubr.msk.f32.gmra.mrb[2].mxu1 %vm26_vm1, %v17_v4  ;;  %p521_p0 = scmp.ne.s32.totalorder %s441_s2, %s520_s21  ;;  %p526_p2 = scmp.lt.s32.totalorder %s520_s21, %s520_s21 }
   0xb   :  { %p527_p3 = por %p526_p2, %p525_p1 }
   0xd   :  { %p528_p4 = pnand %p527_p3, %p521_p0 }
  0xd8   :  { %v106_v6 = vpop.f32.mrb[0].mxu0  ;;  %v111_v7 = vpop.f32.mrb[0].mxu1 }
  0xd9   :  { %v590_v8 = vadd.f32 %v451_v5, %v106_v6  ;;  %v592_v9 = vadd.f32 %v451_v5, %v111_v7  ;;  %v479_v10 = vpop.f32.mrb[1].mxu1  ;;  %v476_v11 = vpop.f32.mrb[1].mxu0 }
  0xdb   :  { %v120_v12 = vand.u32 2147483647, %v590_v8  ;;  %v123_v13 = vand.u32 2139095040, %v590_v8  ;;  %v224_v14 = vand.u32 2147483647, %v592_v9  ;;  %v227_v15 = vand.u32 2139095040, %v592_v9 }
  0xdc   :  { %v116_v16 = vpop.f32.mrb[2].mxu1 }
  0xdd   :  { %v124_v17 = vshrl.u32 %v123_v13, 23  ;;  %v598_v18 = vadd.f32 %v451_v5, %v116_v16  ;;  %v482_v19 = vpop.f32.mrb[3].mxu1  ;;  %v127_v20 = vand.u32 8388607, %v120_v12  ;;  %v228_v21 = vshrl.u32 %v227_v15, 23 }
  0xde   :  { %v231_v22 = vand.u32 8388607, %v224_v14 }
  0xdf   :  { %v456_v23 = vadd.s32 4294967169, %v124_v17  ;;  %v460_v24 = vadd.s32 4294967169, %v228_v21  ;;  %v331_v25 = vand.u32 2139095040, %v598_v18  ;;  %v128_v27 = vor.u32 8388608, %v127_v20 }
  0xe0   :  { %v232_v28 = vor.u32 8388608, %v231_v22 }
  0xe1   :  { %v130_v26 = vadd.s32 1, %v456_v23  ;;  %v234_v29 = vadd.s32 1, %v460_v24  ;;  %v332_v30 = vshrl.u32 %v331_v25, 23  ;;  %v605_v36 = vshll.u32 %v128_v27, 8 }
  0xe2   :  { %v607_v38 = vshll.u32 %v232_v28, 8 }
  0xe3   :  { %vm131_vm3 = vcmp.gt.s32.totalorder %v130_v26, 0  ;;  %vm235_vm4 = vcmp.gt.s32.totalorder %v234_v29, 0  ;;  %v464_v32 = vadd.s32 4294967169, %v332_v30 }
  0xe4   :  { %v132_v31 = vsel %vm131_vm3, %v130_v26, 0  ;;  %v236_v34 = vsel %vm235_vm4, %v234_v29, 0 }
  0xe5   :  { %v134_v33 = vand.u32 31, %v132_v31  ;;  %v133_v35 = vshrl.u32 %v132_v31, 5  ;;  %v238_v37 = vand.u32 31, %v236_v34  ;;  %v614_v50 = vshrl.u32 %v236_v34, 5 }
  0xe6   :  { %v616_v51 = vadd.s32 1, %v464_v32 }
  0xe7   :  { %v135_v39 = vsub.s32 32, %v134_v33  ;;  %v137_v41 = vshll.u32 %v546_v40, %v134_v33  ;;  %v140_v43 = vshll.u32 %v547_v42, %v134_v33  ;;  %v143_v45 = vshll.u32 %v548_v44, %v134_v33 }
  0xe8   :  { %v146_v47 = vshll.u32 %v549_v46, %v134_v33  ;;  %v149_v49 = vshll.u32 %v550_v48, %v134_v33  ;;  %vm152_vm5 = vcmp.lt.s32.totalorder %v133_v35, 1  ;;  %vm153_vm6 = vcmp.lt.s32.totalorder %v133_v35, 2 }
  0xe9   :  { %v136_v52 = vshrl.u32 %v546_v40, %v135_v39  ;;  %v138_v53 = vshrl.u32 %v547_v42, %v135_v39  ;;  %v141_v54 = vshrl.u32 %v548_v44, %v135_v39  ;;  %v144_v55 = vshrl.u32 %v549_v46, %v135_v39 }
  0xea   :  { %v147_v56 = vshrl.u32 %v550_v48, %v135_v39  ;;  %v150_v58 = vshrl.u32 %v551_v57, %v135_v39  ;;  %v239_v62 = vsub.s32 32, %v238_v37  ;;  %vm154_vm7 = vcmp.lt.s32.totalorder %v133_v35, 3 }
  0xeb   :  { %v139_v59 = vor.u32 %v138_v53, %v137_v41  ;;  %v142_v60 = vor.u32 %v141_v54, %v140_v43  ;;  %v145_v61 = vor.u32 %v144_v55, %v143_v45  ;;  %vm155_vm8 = vcmp.lt.s32.totalorder %v133_v35, 4 }
  0xec   :  { %v148_v63 = vor.u32 %v147_v56, %v146_v47  ;;  %v151_v0 = vor.u32 %v150_v58, %v149_v49  ;;  %v241_v10 = vshll.u32 %v546_v40, %v238_v37  ;;  %v242_v15 = vshrl.u32 %v547_v42, %v239_v62 }
  0xed   :  { %v156_v1 = vsel %vm152_vm5, %v136_v52, %v139_v59  ;;  %v157_v2 = vsel %vm155_vm8, %v145_v61, 2102212464  ;;  %v160_v3 = vsel %vm152_vm5, %v139_v59, %v142_v60  ;;  %v164_v4 = vsel %vm152_vm5, %v142_v60, %v145_v61 }
  0xee   :  { %v158_v5 = vsel %vm154_vm7, %v142_v60, %v157_v2  ;;  %v161_v6 = vsel %vm155_vm8, %v148_v63, 920167782  ;;  %v165_v7 = vsel %vm155_vm8, %v151_v0, 1326507024  ;;  %v244_v16 = vshll.u32 %v547_v42, %v238_v37 }
  0xef   :  { %v162_v11 = vsel %vm154_vm7, %v145_v61, %v161_v6  ;;  %v166_v13 = vsel %vm154_vm7, %v148_v63, %v165_v7  ;;  %v159_v17 = vsel %vm153_vm6, %v156_v1, %v158_v5  ;;  %v245_v21 = vshrl.u32 %v548_v44, %v239_v62 }
  0xf0   :  { %v163_v19 = vsel %vm153_vm6, %v160_v3, %v162_v11  ;;  %v167_v20 = vsel %vm153_vm6, %v164_v4, %v166_v13  ;;  %v243_v26 = vor.u32 %v242_v15, %v241_v10  ;;  %v247_v28 = vshll.u32 %v548_v44, %v238_v37 }
  0xf1   :  { %v632_v22 = vmul.u32.u64.low %v605_v36, %v167_v20  ;;  %v633_v23 = vmul.u32.u64.high %v605_v36, %v167_v20, %v632_v22  ;;  %v636_v24 = vmul.u32.u64.low %v605_v36, %v163_v19  ;;  %v637_v25 = vmul.u32.u64.high %v605_v36, %v163_v19, %v636_v24 }
  0xf2   :  { %v246_v27 = vor.u32 %v245_v21, %v244_v16  ;;  %v248_v29 = vshrl.u32 %v549_v46, %v239_v62  ;;  %v240_v30 = vshrl.u32 %v546_v40, %v239_v62  ;;  %v250_v31 = vshll.u32 %v549_v46, %v238_v37 }
  0xf3   :  { %v251_v32 = vshrl.u32 %v550_v48, %v239_v62  ;;  %v254_v33 = vshrl.u32 %v551_v57, %v239_v62  ;;  %v175_v34 = vmul.u32 %v605_v36, %v159_v17  ;;  %v253_v39 = vshll.u32 %v550_v48, %v238_v37 }
  0xf4   :  { %v249_v35 = vor.u32 %v248_v29, %v247_v28  ;;  %vm256_vm9 = vcmp.lt.s32.totalorder %v614_v50, 1  ;;  %vm177_vm10 = vc.u32 %v633_v23, %v636_v24  ;;  %v178_v41 = vadd.s32 1, %v637_v25 }
  0xf5   :  { %v252_v43 = vor.u32 %v251_v32, %v250_v31  ;;  %vm257_vm11 = vcmp.lt.s32.totalorder %v614_v50, 2  ;;  %v255_v45 = vor.u32 %v254_v33, %v253_v39  ;;  %vm258_vm12 = vcmp.lt.s32.totalorder %v614_v50, 3 }
  0xf6   :  { %vm259_vm13 = vcmp.lt.s32.totalorder %v614_v50, 4  ;;  %v264_v47 = vsel %vm256_vm9, %v243_v26, %v246_v27  ;;  %v179_v36 = vsel %vm177_vm10, %v178_v41, %v637_v25  ;;  %v268_v52 = vsel %vm256_vm9, %v246_v27, %v249_v35 }
  0xf7   :  { %v261_v49 = vsel %vm259_vm13, %v249_v35, 2102212464  ;;  %v265_v37 = vsel %vm259_vm13, %v252_v43, 920167782  ;;  %v180_v53 = vadd.s32 %v179_v36, %v175_v34  ;;  %v260_v54 = vsel %vm256_vm9, %v240_v30, %v243_v26 }
  0xf8   :  { %v266_v55 = vsel %vm258_vm12, %v249_v35, %v265_v37  ;;  %v269_v56 = vsel %vm259_vm13, %v255_v45, 1326507024  ;;  %v262_v58 = vsel %vm258_vm12, %v246_v27, %v261_v49  ;;  %vm339_vm14 = vcmp.gt.s32.totalorder %v616_v51, 0 }
  0xf9   :  { %v267_v59 = vsel %vm257_vm11, %v264_v47, %v266_v55  ;;  %v270_v60 = vsel %vm258_vm12, %v252_v43, %v269_v56  ;;  %v181_v61 = vadd.s32 536870912, %v180_v53  ;;  %v340_v3 = vsel %vm339_vm14, %v616_v51, 0 }
  0xfa   :  { %v271_v62 = vsel %vm257_vm11, %v268_v52, %v270_v60  ;;  %v662_v63 = vmul.u32.u64.low %v607_v38, %v267_v59  ;;  %v663_v0 = vmul.u32.u64.high %v607_v38, %v267_v59, %v662_v63  ;;  %v263_v5 = vsel %vm257_vm11, %v260_v54, %v262_v58 }
  0xfb   :  { %v667_v1 = vmul.u32.u64.low %v607_v38, %v271_v62  ;;  %v668_v2 = vmul.u32.u64.high %v607_v38, %v271_v62, %v667_v1  ;;  %v671_v4 = vshrl.u32 %v181_v61, 30  ;;  %v342_v6 = vand.u32 31, %v340_v3 }
  0xfc   :  { %v282_v10 = vadd.s32 1, %v663_v0  ;;  %v328_v11 = vand.u32 2147483647, %v598_v18  ;;  %v279_v15 = vmul.u32 %v607_v38, %v263_v5  ;;  %v341_v26 = vshrl.u32 %v340_v3, 5 }
  0xfd   :  { %v183_v7 = vshll.u32 %v671_v4, 30  ;;  %v343_v13 = vsub.s32 32, %v342_v6  ;;  %vm281_vm15 = vc.u32 %v668_v2, %v662_v63  ;;  %v351_v22 = vshll.u32 %v548_v44, %v342_v6 }
  0xfe   :  { %v283_v51 = vsel %vm281_vm15, %v282_v10, %v663_v0  ;;  %v335_v21 = vand.u32 8388607, %v328_v11  ;;  %v345_v27 = vshll.u32 %v546_v40, %v342_v6  ;;  %v348_v28 = vshll.u32 %v547_v42, %v342_v6 }
  0xff   :  { %v184_v16 = vsub.s32 %v180_v53, %v183_v7  ;;  %v284_v17 = vadd.s32 %v283_v51, %v279_v15  ;;  %v346_v50 = vshrl.u32 %v547_v42, %v343_v13  ;;  %v349_v19 = vshrl.u32 %v548_v44, %v343_v13 }
 0x100   :  { %v352_v25 = vshrl.u32 %v549_v46, %v343_v13  ;;  %v354_v31 = vshll.u32 %v549_v46, %v342_v6  ;;  %v355_v32 = vshrl.u32 %v550_v48, %v343_v13  ;;  %v358_v44 = vshrl.u32 %v551_v57, %v343_v13 }
 0x101   :  { %v186_v20 = vsub.s32 0, %v184_v16  ;;  %v285_v38 = vadd.s32 536870912, %v284_v17  ;;  %v347_v34 = vor.u32 %v346_v50, %v345_v27  ;;  %v350_v35 = vor.u32 %v349_v19, %v348_v28 }
 0x102   :  { %v353_v30 = vor.u32 %v352_v25, %v351_v22  ;;  %v336_v41 = vor.u32 8388608, %v335_v21  ;;  %v356_v43 = vor.u32 %v355_v32, %v354_v31  ;;  %v344_v47 = vshrl.u32 %v546_v40, %v343_v13 }
 0x103   :  { %v457_v29 = vmin.u32 %v186_v20, %v184_v16  ;;  %v692_v33 = vshrl.u32 %v285_v38, 30  ;;  %v357_v42 = vshll.u32 %v550_v48, %v342_v6  ;;  %vm363_vm0 = vcmp.lt.s32.totalorder %v341_v26, 4 }
 0x104   :  { %vm360_vm1 = vcmp.lt.s32.totalorder %v341_v26, 1  ;;  %vm362_vm2 = vcmp.lt.s32.totalorder %v341_v26, 3  ;;  %v365_v46 = vsel %vm363_vm0, %v353_v30, 2102212464  ;;  %v369_v57 = vsel %vm363_vm0, %v356_v43, 920167782 }
 0x105   :  { %v188_v39 = vclz %v457_v29  ;;  %v287_v45 = vshll.u32 %v692_v33, 30  ;;  %v359_v37 = vor.u32 %v358_v44, %v357_v42  ;;  %v368_v52 = vsel %vm360_vm1, %v347_v34, %v350_v35 }
 0x106   :  { %v364_v53 = vsel %vm360_vm1, %v344_v47, %v347_v34  ;;  %v366_v54 = vsel %vm362_vm2, %v350_v35, %v365_v46  ;;  %v370_v40 = vsel %vm362_vm2, %v353_v30, %v369_v57  ;;  %v176_v48 = vadd.s32 %v636_v24, %v633_v23 }
 0x107   :  { %v458_v36 = vadd.s32 4294967294, %v188_v39  ;;  %v288_v49 = vsub.s32 %v284_v17, %v287_v45  ;;  %vm361_vm4 = vcmp.lt.s32.totalorder %v341_v26, 2  ;;  %v372_v61 = vsel %vm360_vm1, %v350_v35, %v353_v30 }
 0x108   :  { %v371_v60 = vsel %vm361_vm4, %v368_v52, %v370_v40  ;;  %v367_v0 = vsel %vm361_vm4, %v364_v53, %v366_v54  ;;  %v373_v1 = vsel %vm363_vm0, %v359_v37, 1326507024  ;;  %v376_v3 = vshll.u32 %v336_v41, 8 }
 0x109   :  { %vm459_vm3 = vcmp.lt.s32.totalorder %v458_v36, 0  ;;  %v290_v56 = vsub.s32 0, %v288_v49  ;;  %v374_v10 = vsel %vm362_vm2, %v356_v43, %v373_v1  ;;  %v280_v27 = vadd.s32 %v662_v63, %v668_v2 }
 0x10a   :  { %v191_v55 = vsel %vm459_vm3, 0, %v458_v36  ;;  %v375_v23 = vsel %vm361_vm4, %v372_v61, %v374_v10  ;;  %v709_v24 = vmul.u32.u64.low %v376_v3, %v371_v60  ;;  %v710_v15 = vmul.u32.u64.high %v376_v3, %v371_v60, %v709_v24 }
 0x10b   :  { %v192_v58 = vsub.s32 32, %v191_v55  ;;  %v196_v59 = vsub.s32 4294967266, %v191_v55  ;;  %v461_v62 = vmin.u32 %v290_v56, %v288_v49  ;;  %v193_v5 = vshll.u32 %v184_v16, %v191_v55 }
 0x10c   :  { %v713_v50 = vmul.u32.u64.low %v376_v3, %v375_v23  ;;  %v714_v19 = vmul.u32.u64.high %v376_v3, %v375_v23, %v713_v50  ;;  %v383_v22 = vmul.u32 %v376_v3, %v367_v0  ;;  %v386_v16 = vadd.s32 1, %v710_v15 }
 0x10d   :  { %v194_v6 = vshrl.u32 %v176_v48, %v192_v58  ;;  %v197_v7 = vadd.s32 127, %v196_v59  ;;  %v292_v13 = vclz %v461_v62  ;;  %v206_v32 = vsub.s32 4, %v671_v4 }
 0x10e   :  { %vm385_vm6 = vc.u32 %v714_v19, %v709_v24  ;;  %vm122_vm7 = vcmp.lt.s32.totalorder %v590_v8, 0  ;;  %vm121_vm8 = vcmp.le.f32.partialorder %v120_v12, 0.7853982  ;;  %v310_v53 = vsub.s32 4, %v692_v33 }
 0x10f   :  { %v195_v51 = vor.u32 %v194_v6, %v193_v5  ;;  %v198_v17 = vshll.u32 %v197_v7, 23  ;;  %v462_v20 = vadd.s32 4294967294, %v292_v13  ;;  %v387_v30 = vsel %vm385_vm6, %v386_v16, %v710_v15 }
 0x110   :  { %v388_v34 = vadd.s32 %v387_v30, %v383_v22  ;;  %v207_v2 = vsel %vm122_vm7, %v206_v32, %v671_v4  ;;  %vm226_vm9 = vcmp.lt.s32.totalorder %v592_v9, 0  ;;  %vm225_vm10 = vcmp.le.f32.partialorder %v224_v14, 0.7853982 }
 0x111   :  { %v199_v21 = vor.u32 4788187, %v198_v17  ;;  %vm463_vm5 = vcmp.lt.s32.totalorder %v462_v20, 0  ;;  %v202_v38 = vcvt.s32.f32 %v195_v51  ;;  %v209_v37 = vsel %vm121_vm8, 0, %v207_v2 }
 0x112   :  { %v295_v26 = vsel %vm463_vm5, 0, %v462_v20  ;;  %v389_v43 = vadd.s32 536870912, %v388_v34  ;;  %v213_v12 = vadd.s32 3, %v209_v37  ;;  %v311_v55 = vsel %vm226_vm9, %v310_v53, %v692_v33 }
 0x113   :  { %v200_v25 = vand.u32 2147483647, %v199_v21  ;;  %v296_v28 = vsub.s32 32, %v295_v26  ;;  %v300_v29 = vsub.s32 4294967266, %v295_v26  ;;  %v297_v35 = vshll.u32 %v288_v49, %v295_v26 }
 0x114   :  { %v727_v42 = vshrl.u32 %v389_v43, 30  ;;  %v214_v59 = vand.u32 3, %v213_v12  ;;  %v313_v62 = vsel %vm225_vm10, 0, %v311_v55  ;;  %v384_v10 = vadd.s32 %v709_v24, %v714_v19 }
 0x115   :  { %v203_v31 = vmul.f32 %v202_v38, %v200_v25  ;;  %v298_v44 = vshrl.u32 %v280_v27, %v296_v28  ;;  %v301_v39 = vadd.s32 127, %v300_v29  ;;  %v317_v6 = vadd.s32 3, %v313_v62 }
 0x116   :  { %v391_v49 = vshll.u32 %v727_v42, 30  ;;  %vm219_vm12 = vcmp.eq.s32.totalorder %v214_v59, 2  ;;  %vm215_vm13 = vcmp.lt.s32.totalorder %v214_v59, 2  ;;  %vm216_vm14 = vcmp.eq.s32.totalorder %v214_v59, 0 }
 0x117   :  { %v204_v41 = vxor.u32 2147483648, %v203_v31  ;;  %v299_v45 = vor.u32 %v298_v44, %v297_v35  ;;  %v302_v47 = vshll.u32 %v301_v39, 23  ;;  %vm212_vm15 = vweird.f32 %v590_v8 }
 0x118   :  { %v392_v54 = vsub.s32 %v388_v34, %v391_v49  ;;  %v318_v22 = vand.u32 3, %v317_v6  ;;  %v414_v32 = vsub.s32 4, %v727_v42  ;;  %vm316_vm3 = vweird.f32 %v592_v9 }
 0x119   :  { %v205_v63 = vsel %vm122_vm7, %v204_v41, %v203_v31  ;;  %v303_v46 = vor.u32 4788187, %v302_v47  ;;  %v306_v57 = vcvt.s32.f32 %v299_v45  ;;  %vm330_vm4 = vcmp.lt.s32.totalorder %v598_v18, 0 }
 0x11a   :  { %v208_v36 = vsel %vm121_vm8, %v590_v8, %v205_v63  ;;  %v394_v48 = vsub.s32 0, %v392_v54  ;;  %vm323_vm0 = vcmp.eq.s32.totalorder %v318_v22, 2  ;;  %vm320_vm1 = vcmp.eq.s32.totalorder %v318_v22, 0 }
 0x11b   :  { %508 = vcosq.f32 %v208_v36  ;;  %v304_v52 = vand.u32 2147483647, %v303_v46  ;;  %vm319_vm2 = vcmp.lt.s32.totalorder %v318_v22, 2  ;;  %vm329_vm5 = vcmp.le.f32.partialorder %v328_v11, 0.7853982 }
 0x11c   :  { %510 = vsinq.f32 %v208_v36  ;;  %v465_v56 = vmin.u32 %v394_v48, %v392_v54  ;;  %v415_v41 = vsel %vm330_vm4, %v414_v32, %v727_v42 }
 0x11d   :  { %v307_v40 = vmul.f32 %v306_v57, %v304_v52  ;;  %v417_v45 = vsel %vm329_vm5, 0, %v415_v41 }
 0x11e   :  { %v396_v61 = vclz %v465_v56  ;;  %v421_v47 = vadd.s32 3, %v417_v45 }
 0x11f   :  { %v308_v4 = vxor.u32 2147483648, %v307_v40 }
 0x120   :  { %v466_v1 = vadd.s32 4294967294, %v396_v61  ;;  %v422_v63 = vand.u32 3, %v421_v47 }
 0x121   :  { %v309_v58 = vsel %vm226_vm9, %v308_v4, %v307_v40  ;;  %vm420_vm9 = vweird.f32 %v598_v18 }
 0x122   :  { %v312_v60 = vsel %vm225_vm10, %v592_v9, %v309_v58  ;;  %vm467_vm11 = vcmp.lt.s32.totalorder %v466_v1, 0  ;;  %vm427_vm6 = vcmp.eq.s32.totalorder %v422_v63, 2  ;;  %vm424_vm7 = vcmp.eq.s32.totalorder %v422_v63, 0 }
 0x123   :  { %512 = vcosq.f32 %v312_v60  ;;  %v399_v33 = vsel %vm467_vm11, 0, %v466_v1  ;;  %vm423_vm8 = vcmp.lt.s32.totalorder %v422_v63, 2 }
 0x124   :  { %514 = vsinq.f32 %v312_v60  ;;  %v400_v13 = vsub.s32 32, %v399_v33  ;;  %v404_v23 = vsub.s32 4294967266, %v399_v33  ;;  %v401_v17 = vshll.u32 %v392_v54, %v399_v33 }
 0x125   :  { %v509_v0 = vpop.eup %508 }
 0x126   :  { %v511_v3 = vpop.eup %510  ;;  %v220_v5 = vxor.u32 2147483648, %v509_v0  ;;  %v402_v50 = vshrl.u32 %v384_v10, %v400_v13  ;;  %v405_v20 = vadd.s32 127, %v404_v23 }
 0x127   :  { %v217_v7 = vxor.u32 2147483648, %v511_v3 }
 0x128   :  { %v221_v14 = vsel %vm219_vm12, %v220_v5, %v511_v3  ;;  %v403_v16 = vor.u32 %v402_v50, %v401_v17  ;;  %v406_v25 = vshll.u32 %v405_v20, 23 }
 0x129   :  { %v218_v15 = vsel %vm216_vm14, %v509_v0, %v217_v7 }
 0x12a   :  { %v222_v51 = vsel %vm215_vm13, %v218_v15, %v221_v14  ;;  %v407_v27 = vor.u32 4788187, %v406_v25  ;;  %v410_v19 = vcvt.s32.f32 %v403_v16 }
 0x12b   :  { %v223_v21 = vsel %vm212_vm15, nan, %v222_v51 }
 0x12c   :  { %432 = vst [vmem:[#allocation2] sm:$0xff] %v223_v21  ;;  %v408_v24 = vand.u32 2147483647, %v407_v27 }
 0x12d   :  { %v513_v38 = vpop.eup %512 }
 0x12e   :  { %v515_v26 = vpop.eup %514  ;;  %v324_v28 = vxor.u32 2147483648, %v513_v38  ;;  %v411_v31 = vmul.f32 %v410_v19, %v408_v24 }
 0x12f   :  { %v321_v29 = vxor.u32 2147483648, %v515_v26 }
 0x130   :  { %v325_v30 = vsel %vm323_vm0, %v324_v28, %v515_v26  ;;  %v412_v44 = vxor.u32 2147483648, %v411_v31 }
 0x131   :  { %v322_v8 = vsel %vm320_vm1, %v513_v38, %v321_v29 }
 0x132   :  { %v326_v34 = vsel %vm319_vm2, %v322_v8, %v325_v30  ;;  %v413_v39 = vsel %vm330_vm4, %v412_v44, %v411_v31 }
 0x133   :  { %v327_v35 = vsel %vm316_vm3, nan, %v326_v34  ;;  %v416_v43 = vsel %vm329_vm5, %v598_v18, %v413_v39 }
 0x134   :  { %433 = vst [vmem:[#allocation2 + $0x8] sm:$0xff] %v327_v35  ;;  %516 = vcosq.f32 %v416_v43 }
 0x135   :  { %518 = vsinq.f32 %v416_v43 }
 0x13e   :  { %v517_v9 = vpop.eup %516 }
 0x13f   :  { %v519_v2 = vpop.eup %518  ;;  %v428_v36 = vxor.u32 2147483648, %v517_v9 }
 0x140   :  { %v425_v46 = vxor.u32 2147483648, %v519_v2 }
 0x141   :  { %v429_v49 = vsel %vm427_vm6, %v428_v36, %v519_v2 }
 0x142   :  { %v426_v11 = vsel %vm424_vm7, %v517_v9, %v425_v46 }
 0x143   :  { %v430_v42 = vsel %vm423_vm8, %v426_v11, %v429_v49 }
 0x144   :  { %v431_v37 = vsel %vm420_vm9, nan, %v430_v42 }
 0x145   :  { %434 = vst [vmem:[#allocation2 + $0x10] sm:$0xff] %v431_v37 }
 0x146   :  { %531 = shalt.err (!%p528_p4)
}
 0x147   :  { %s532_s24 = scalar_lea.hbm %s763_s3, 384 }
 0x148   :  { %p533_p5 = scmp.ne.s32.totalorder %s763_s3, %s532_s24  ;;  %p536_p6 = scmp.lt.u32.totalorder %s532_s24, %s763_s3 }
 0x14a   :  { %p538_p7 = pnand %p536_p6, %p533_p5 }
 0x14c   :  { %541 = shalt.err (!%p538_p7)
}
 0x14d   :  { %s553_s29 = smov 128   ;;  %s554_s30 = smov 8  }
 0x14e   :  { %446 = dma.vmem_to_hbm [thread:$0]  %s441_s2, 384, %s763_s3, [#allocation3], %s553_s29, %s553_s29, %s554_s30  }
 0x14f   :  { %542 = dma.done.wait [#allocation3], 384  }
 0x150   :  { %543 = vsyncadd [#allocation3], 4294966912 }
 0x151   :  { %450 = vsyncpa [#allocation3], 1 }

</bundles_post_ra>
